<compile_context>
chip_gen: v6e
topology: v6e:2x2x1
jax: 0.10.0
libtpu: 0.0.40
codegen_flags: <defaults>
</compile_context>

<pallas_src>
import math

import jax
import jax.numpy as jnp
from jax.experimental import pallas as pl
from jax.experimental.pallas import tpu as pltpu


_LANES = 512                        # 4 * 128 lanes -> unmasked full-width vst
_MAX_BLOCK_ROWS = 512               # 512 x 512 f32 = 1 MiB / block / array
_BLOCK_ELEMS = _MAX_BLOCK_ROWS * _LANES   # 262144 elements per block per array
_SMALL_N_ELEMS = _BLOCK_ELEMS       # below this, plain XLA fusion wins


def _round_up(x, m):
    return -(-x // m) * m


def _param_loss_kernel(out_ref, gt_ref, valid_ref, loss_ref):
    # out_ref / gt_ref / loss_ref: (block_R, block_C) tiles.
    # valid_ref: same tile, or (block_R, 1) for the row-broadcast path.
    a = out_ref[...].astype(jnp.float32)
    b = gt_ref[...].astype(jnp.float32)
    v = valid_ref[...].astype(jnp.float32)
    loss_ref[...] = (jnp.abs(a - b) * v).astype(loss_ref.dtype)


def _as_array(x):
    x = jnp.asarray(x)
    if x.dtype == jnp.bool_:
        x = x.astype(jnp.float32)
    return x


def _row_broadcast_split(out_shape, valid_shape):
    """Return k such that `valid` matches out_shape[:k] exactly and is size-1
    over all trailing dims (i.e. constant along them); None if not this form."""
    nd = len(out_shape)
    vs = (1,) * (nd - len(valid_shape)) + tuple(valid_shape)
    k = nd
    while k > 0 and vs[k - 1] == 1:
        k -= 1
    if tuple(vs[:k]) != tuple(out_shape[:k]):
        return None
    return k


def _param_loss_flat(a, b, v, out_dtype, out_shape):
    """Same-shape path: lane-dense (rows, 512) slab, 1-D grid over rows."""
    n = int(math.prod(out_shape)) if out_shape else 1
    rows_needed = -(-n // _LANES)
    n_blocks = -(-rows_needed // _MAX_BLOCK_ROWS)
    if rows_needed >= 16:
        n_blocks = max(n_blocks, 2)        # keep both v7x TensorCores busy
    if n_blocks == 1:
        block_rows = rows_needed           # full-extent block (any size ok)
    else:
        block_rows = _round_up(-(-rows_needed // n_blocks), 8)  # balanced
    rows = n_blocks * block_rows
    padded = rows * _LANES

    def to_slab(x):
        flat = x.reshape(-1)
        if padded != n:                    # skip the extra HBM pass if aligned
            flat = jnp.pad(flat, (0, padded - n))
        return flat.reshape(rows, _LANES)

    spec = pl.BlockSpec((block_rows, _LANES), lambda i: (i, 0))
    out = pl.pallas_call(
        _param_loss_kernel,
        out_shape=jax.ShapeDtypeStruct((rows, _LANES), out_dtype),
        grid=(n_blocks,),
        in_specs=[spec, spec, spec],
        out_specs=spec,
        compiler_params=pltpu.CompilerParams(
            dimension_semantics=("parallel",),
            allow_input_fusion=[True, True, True]),
    )(to_slab(a), to_slab(b), to_slab(v))

    if padded == n:
        return out.reshape(out_shape)
    return out.reshape(-1)[:n].reshape(out_shape)


def _bcast_geometry(R, C):
    """Pick (R_pad, C_pad, block_R, block_C, grid) for the row-broadcast path.
    Per-array block <= _BLOCK_ELEMS elements (<= 1 MiB f32)."""
    C_pad = _round_up(C, 128)
    if R * C_pad <= _BLOCK_ELEMS:
        return R, C_pad, R, C_pad, (1, 1)
    if C_pad <= _BLOCK_ELEMS // 8:
        # Tile rows only; block_C is the full (padded) row.
        block_C = C_pad
        max_br = max(8, (_BLOCK_ELEMS // C_pad) // 8 * 8)
        n_rb = -(-R // max_br)
        block_R = _round_up(-(-R // n_rb), 8)      # balanced row blocks
        R_pad = n_rb * block_R
        return R_pad, C_pad, block_R, block_C, (n_rb, 1)
    # Very wide rows: small row chunk, tile columns.
    if R < 8:
        block_R, R_pad = R, R
    else:
        block_R, R_pad = 8, _round_up(R, 8)
    max_bc = max(128, (_BLOCK_ELEMS // block_R) // 128 * 128)
    n_cb = -(-C_pad // max_bc)
    block_C = _round_up(-(-C_pad // n_cb), 128)    # balanced column blocks
    C_pad = n_cb * block_C
    return R_pad, C_pad, block_R, block_C, (R_pad // block_R, n_cb)


def _param_loss_rowbcast(a, b, v, R, C, out_dtype, out_shape):
    """Broadcast-valid path: params as (R, C), valid stays (R, 1) in HBM and
    is broadcast across lanes inside the kernel."""
    a2 = a.reshape(R, C)
    b2 = b.reshape(R, C)
    v2 = v.reshape(R, 1)

    R_pad, C_pad, block_R, block_C, grid = _bcast_geometry(R, C)

    if (R_pad, C_pad) != (R, C):
        pad = ((0, R_pad - R), (0, C_pad - C))
        a2 = jnp.pad(a2, pad)
        b2 = jnp.pad(b2, pad)
    if R_pad != R:
        v2 = jnp.pad(v2, ((0, R_pad - R), (0, 0)))

    mat_spec = pl.BlockSpec((block_R, block_C), lambda i, j: (i, j))
    v_spec = pl.BlockSpec((block_R, 1), lambda i, j: (i, 0))

    out = pl.pallas_call(
        _param_loss_kernel,
        out_shape=jax.ShapeDtypeStruct((R_pad, C_pad), out_dtype),
        grid=grid,
        in_specs=[mat_spec, mat_spec, v_spec],
        out_specs=mat_spec,
        compiler_params=pltpu.CompilerParams(
            dimension_semantics=("parallel", "parallel"),
            allow_input_fusion=[True, True, True]),
    )(a2, b2, v2)

    if (R_pad, C_pad) != (R, C):
        out = out[:R, :C]
    return out.reshape(out_shape)


def param_loss(param_out, param_gt, valid, *, force_pallas=False):
    """Pallas implementation of ParamLoss.forward: |param_out - param_gt| * valid."""
    param_out = _as_array(param_out)
    param_gt = _as_array(param_gt)
    valid = _as_array(valid)

    out_shape = jnp.broadcast_shapes(param_out.shape, param_gt.shape, valid.shape)
    out_dtype = jnp.result_type(param_out.dtype, param_gt.dtype, valid.dtype)
    if not jnp.issubdtype(out_dtype, jnp.floating):
        out_dtype = jnp.float32

    if param_out.shape != out_shape:
        param_out = jnp.broadcast_to(param_out, out_shape)
    if param_gt.shape != out_shape:
        param_gt = jnp.broadcast_to(param_gt, out_shape)

    n = int(math.prod(out_shape)) if out_shape else 1
    if n == 0:
        return jnp.zeros(out_shape, out_dtype)

    # Small problems: pallas_call fixed overhead dwarfs the work -> fused XLA.
    if n < _SMALL_N_ELEMS and not force_pallas:
        a = param_out.astype(jnp.float32)
        b = param_gt.astype(jnp.float32)
        v = valid.astype(jnp.float32)
        return (jnp.abs(a - b) * v).astype(out_dtype)

    # Broadcast `valid` handled in-kernel when it is constant over trailing dims.
    if valid.shape != out_shape:
        k = _row_broadcast_split(out_shape, valid.shape)
        if k is not None:
            R = int(math.prod(out_shape[:k])) if k > 0 else 1
            C = int(math.prod(out_shape[k:])) if k < len(out_shape) else 1
            if C >= 2:
                return _param_loss_rowbcast(param_out, param_gt, valid, R, C,
                                            out_dtype, out_shape)
            valid = valid.reshape(out_shape)     # same element count; free
        if valid.shape != out_shape:
            # Uncommon broadcast layout: materialize (rare path).
            valid = jnp.broadcast_to(valid, out_shape)

    return _param_loss_flat(param_out, param_gt, valid, out_dtype, out_shape)


def _reference(param_out, param_gt, valid):
    out_dtype = jnp.result_type(param_out.dtype, param_gt.dtype, valid.dtype)
    a = param_out.astype(jnp.float32)
    b = param_gt.astype(jnp.float32)
    v = valid.astype(jnp.float32)
    return (jnp.abs(a - b) * v).astype(out_dtype)


if __name__ == "__main__":
    key = jax.random.PRNGKey(0)
    ks = jax.random.split(key, 8)

    # 1) Real ParamLoss size: (B=2, P=72) flattened pose params.
    B, P = 2, 72
    a = jax.random.normal(ks[0], (B, P), jnp.float32)
    b = jax.random.normal(ks[1], (B, P), jnp.float32)
    v = (jax.random.uniform(ks[2], (B, P)) > 0.3).astype(jnp.float32)

    ref = _reference(a, b, v)
    out_fb = jax.block_until_ready(param_loss(a, b, v))                       # XLA fallback
    out_pk = jax.block_until_ready(param_loss(a, b, v, force_pallas=True))    # Pallas slab path
    assert out_fb.shape == ref.shape and out_pk.shape == ref.shape
    assert jnp.allclose(out_fb, ref, atol=1e-6), "mismatch (small, fallback)"
    assert jnp.allclose(out_pk, ref, atol=1e-6), "mismatch (small, pallas)"

    # 2) Broadcast valid (per-sample flag, (B, 1)) -> in-kernel row broadcast.
    v_b = (jax.random.uniform(ks[3], (B, 1)) > 0.5).astype(jnp.float32)
    ref_b = _reference(a, b, v_b)
    out_b = jax.block_until_ready(param_loss(a, b, v_b, force_pallas=True))
    assert jnp.allclose(out_b, ref_b, atol=1e-6), "mismatch (broadcast, pallas)"
    assert jnp.allclose(jax.block_until_ready(param_loss(a, b, v_b)), ref_b,
                        atol=1e-6), "mismatch (broadcast, fallback)"

    # 3) bf16 inputs: native-dtype I/O, bf16 output.
    a16, b16, v16 = (x.astype(jnp.bfloat16) for x in (a, b, v))
    ref16 = _reference(a16, b16, v16)
    out16 = jax.block_until_ready(param_loss(a16, b16, v16, force_pallas=True))
    assert out16.dtype == jnp.bfloat16
    assert jnp.allclose(out16.astype(jnp.float32), ref16.astype(jnp.float32),
                        atol=1e-2), "mismatch (bf16)"

    # 4) Larger flattened params: natural Pallas dispatch, 2 grid steps,
    #    flat size tiles exactly -> no pad and no tail slice.
    M, N = 64, 4608
    a_l = jax.random.normal(ks[4], (M, N), jnp.float32)
    b_l = jax.random.normal(ks[5], (M, N), jnp.float32)
    v_l = (jax.random.uniform(ks[6], (M, N)) > 0.3).astype(jnp.float32)
    out_l = jax.block_until_ready(param_loss(a_l, b_l, v_l))
    assert jnp.allclose(out_l, _reference(a_l, b_l, v_l), atol=1e-6), "mismatch (large)"

    # 5) Larger broadcast-valid case: natural dispatch through the 2-D
    #    row-broadcast kernel (valid stays (R, 1) in HBM).
    R2, C2 = 640, 512
    a_r = jax.random.normal(ks[7], (R2, C2), jnp.float32)
    b_r = jax.random.normal(ks[0], (R2, C2), jnp.float32)
    v_r = (jax.random.uniform(ks[1], (R2, 1)) > 0.5).astype(jnp.float32)
    out_r = jax.block_until_ready(param_loss(a_r, b_r, v_r))
    assert jnp.allclose(out_r, _reference(a_r, b_r, v_r), atol=1e-6), "mismatch (large bcast)"

    print("KERNEL_OK")
</pallas_src>

<mosaic_0001>
module attributes {stable_mosaic.version = 11 : i64} {
  func.func @_param_loss_kernel(%arg0: i32, %arg1: memref<1x512xf32, #tpu.memory_space<vmem>>, %arg2: memref<1x512xf32, #tpu.memory_space<vmem>>, %arg3: memref<1x512xf32, #tpu.memory_space<vmem>>, %arg4: memref<1x512xf32, #tpu.memory_space<vmem>>) attributes {dimension_semantics = [#tpu.dimension_semantics<parallel>], iteration_bounds = array<i64: 1>, scalar_prefetch = 0 : i64, scratch_operands = 0 : i64, tpu.core_type = #tpu.core_type<tc>, window_params = [{transform_indices = @transform_0, window_bounds = array<i64: 1, 512>}, {transform_indices = @transform_1, window_bounds = array<i64: 1, 512>}, {transform_indices = @transform_2, window_bounds = array<i64: 1, 512>}, {transform_indices = @transform_3, window_bounds = array<i64: 1, 512>}]} {
    %c0 = arith.constant 0 : index
    %c0_0 = arith.constant 0 : index
    %0 = vector.load %arg1[%c0, %c0_0] : memref<1x512xf32, #tpu.memory_space<vmem>>, vector<1x512xf32>
    %c0_1 = arith.constant 0 : index
    %c0_2 = arith.constant 0 : index
    %1 = vector.load %arg2[%c0_1, %c0_2] : memref<1x512xf32, #tpu.memory_space<vmem>>, vector<1x512xf32>
    %c0_3 = arith.constant 0 : index
    %c0_4 = arith.constant 0 : index
    %2 = vector.load %arg3[%c0_3, %c0_4] : memref<1x512xf32, #tpu.memory_space<vmem>>, vector<1x512xf32>
    %3 = arith.subf %0, %1 : vector<1x512xf32>
    %4 = math.absf %3 : vector<1x512xf32>
    %5 = arith.mulf %4, %2 : vector<1x512xf32>
    %c0_5 = arith.constant 0 : index
    %c0_6 = arith.constant 0 : index
    %6 = vector.load %arg4[%c0_5, %c0_6] : memref<1x512xf32, #tpu.memory_space<vmem>>, vector<1x512xf32>
    tpu.vector_store %arg4[%c0_5, %c0_6], %5 {strides = array<i32>} : memref<1x512xf32, #tpu.memory_space<vmem>>, vector<1x512xf32>,
    return
  }
  func.func @transform_0(%arg0: i32) -> (i32, i32) {
    %c0_i32 = arith.constant 0 : i32
    %c0_i32_0 = arith.constant 0 : i32
    return %arg0, %c0_i32 : i32, i32
  }
  func.func @transform_1(%arg0: i32) -> (i32, i32) {
    %c0_i32 = arith.constant 0 : i32
    %c0_i32_0 = arith.constant 0 : i32
    return %arg0, %c0_i32 : i32, i32
  }
  func.func @transform_2(%arg0: i32) -> (i32, i32) {
    %c0_i32 = arith.constant 0 : i32
    %c0_i32_0 = arith.constant 0 : i32
    return %arg0, %c0_i32 : i32, i32
  }
  func.func @transform_3(%arg0: i32) -> (i32, i32) {
    %c0_i32 = arith.constant 0 : i32
    %c0_i32_0 = arith.constant 0 : i32
    return %arg0, %c0_i32 : i32, i32
  }
}

</mosaic_0001>

<bundles_post_ra>
// kernel: tpu_custom_call.1
= control target key start
LH: loop header
LB: loop body
LE: loop exit
PB: predicated region body
PF: predicated region fallthrough
CT: control target
= control target key end

     0   :  { %8 = vsyncpa [#allocation3], 0  ;;  %s203_s0 = inlined_call_operand.hbm [shape: f32[1,512], index: 0, kind: input, shape index: {}]   ;;  %s204_s1 = inlined_call_operand.hbm [shape: f32[1,512], index: 1, kind: input, shape index: {}]   ;;  %s205_s2 = inlined_call_operand.hbm [shape: f32[1,512], index: 2, kind: input, shape index: {}]   ;;  %s206_s3 = inlined_call_operand.hbm [shape: f32[1,512], index: 3, kind: output, shape index: {}]  }
   0x1   :  { %9 = vsyncpa [#allocation6], 0 }
   0x2   :  { %10 = vsyncpa [#allocation4], 0  ;;  %s167_s12 = smov [#allocation5]   ;;  %s168_s14 = smov [#allocation2]  }
   0x3   :  { %s27_s13 = sshll.u32 %s167_s12, 4  ;;  %s17_s15 = sshll.u32 %s168_s14, 4  ;;  %s28_s13 = int_to_ptr.vmem [resolvable:$true] %s27_s13  ;;  %s18_s15 = int_to_ptr.vmem [resolvable:$true] %s17_s15 }
   0x4   :  { %s89_s16 = scalar_lea.vmem %s28_s13, 64  ;;  %p94_p1 = scmp.lt.s32.totalorder %s28_s13, %s28_s13 }
   0x5   :  { %p90_p0 = scmp.ne.s32.totalorder %s28_s13, %s89_s16  ;;  %p95_p2 = scmp.lt.s32.totalorder %s89_s16, %s89_s16 }
   0x7   :  { %p96_p3 = por %p95_p2, %p94_p1 }
   0x9   :  { %p97_p4 = pnand %p96_p3, %p90_p0 }
   0xb   :  { %100 = shalt.err (!%p97_p4)
}
   0xc   :  { %30 = dma.hbm_to_vmem [thread:$0]  %s204_s1, 64, %s28_s13, [#allocation6]  }
   0xd   :  { %s109_s19 = scalar_lea.vmem %s18_s15, 64  ;;  %p114_p6 = scmp.lt.s32.totalorder %s18_s15, %s18_s15 }
   0xe   :  { %p110_p5 = scmp.ne.s32.totalorder %s18_s15, %s109_s19  ;;  %p115_p7 = scmp.lt.s32.totalorder %s109_s19, %s109_s19 }
  0x10   :  { %p116_p8 = por %p115_p7, %p114_p6 }
  0x12   :  { %p117_p9 = pnand %p116_p8, %p110_p5 }
  0x14   :  { %120 = shalt.err (!%p117_p9)
}
  0x15   :  { %20 = dma.hbm_to_vmem [thread:$0]  %s203_s0, 64, %s18_s15, [#allocation3]  }
  0x16   :  { %s169_s22 = smov [#allocation7]  }
  0x17   :  { %s37_s23 = sshll.u32 %s169_s22, 4  ;;  %s38_s23 = int_to_ptr.vmem [resolvable:$true] %s37_s23 }
  0x18   :  { %s129_s24 = scalar_lea.vmem %s38_s23, 64  ;;  %p134_p11 = scmp.lt.s32.totalorder %s38_s23, %s38_s23 }
  0x19   :  { %p130_p10 = scmp.ne.s32.totalorder %s38_s23, %s129_s24  ;;  %p135_p12 = scmp.lt.s32.totalorder %s129_s24, %s129_s24 }
  0x1b   :  { %p136_p13 = por %p135_p12, %p134_p11 }
  0x1d   :  { %p137_p0 = pnand %p136_p13, %p130_p10 }
  0x1f   :  { %140 = shalt.err (!%p137_p0)
}
  0x20   :  { %40 = dma.hbm_to_vmem [thread:$0]  %s205_s2, 64, %s38_s23, [#allocation6]  }
  0x21   :  { %161 = dma.done.wait [#allocation3], 64  }
  0x22   :  { %162 = vsyncadd [#allocation3], 4294967232 }
  0x23   :  { %163 = dma.done.wait [#allocation6], 128  }
  0x24   :  { %164 = vsyncadd [#allocation6], 4294967168  ;;  %v50_v0 = vld [vmem:[#allocation2] sm:$0xf]  ;;  %v51_v1 = vld [vmem:[#allocation5] sm:$0xf]  ;;  %v56_v2 = vlaneseq }
  0x25   :  { %v53_v3 = vsub.f32 %v50_v0, %v51_v1  ;;  %v52_v4 = vld [vmem:[#allocation7] sm:$0xf]  ;;  %s170_s0 = smov [#allocation8]  }
  0x26   :  { %s67_s26 = sshll.u32 %s170_s0, 4  ;;  %vm58_vm0 = vcmp.lt.s32.totalorder %v56_v2, 512  ;;  %s68_s26 = int_to_ptr.vmem [resolvable:$true] %s67_s26 }
  0x27   :  { %v54_v5 = vand.u32 2147483647, %v53_v3  ;;  %s141_s27 = scalar_lea.vmem %s68_s26, 64  ;;  %p146_p2 = scmp.lt.s32.totalorder %s68_s26, %s68_s26 }
  0x28   :  { %p142_p1 = scmp.ne.s32.totalorder %s68_s26, %s141_s27  ;;  %p147_p3 = scmp.lt.s32.totalorder %s141_s27, %s141_s27 }
  0x29   :  { %v55_v6 = vmul.f32 %v54_v5, %v52_v4 }
  0x2a   :  { %p148_p4 = por %p147_p3, %p146_p2 }
  0x2b   :  { %60 = vst.msk [vmem:[#allocation8] sm:$0xf] %vm58_vm0, %v55_v6 }
  0x2c   :  { %p149_p5 = pnand %p148_p4, %p142_p1 }
  0x2e   :  { %152 = shalt.err (!%p149_p5)
}
  0x2f   :  { %70 = dma.vmem_to_hbm [thread:$0]  %s68_s26, 64, %s206_s3, [#allocation4]  }
  0x30   :  { %165 = dma.done.wait [#allocation4], 64  }
  0x31   :  { %166 = vsyncadd [#allocation4], 4294967232 }
  0x32   :  { %74 = vsyncpa [#allocation3], 1 }
  0x33   :  { %75 = vsyncpa [#allocation6], 1 }
  0x34   :  { %76 = vsyncpa [#allocation4], 1 }

</bundles_post_ra>
